<compile_context>
chip_gen: v6e
topology: v6e:2x2x1
jax: 0.10.0
libtpu: 0.0.40
codegen_flags: <defaults>
</compile_context>

<pallas_src>
import jax
import jax.numpy as jnp
from jax.experimental import pallas as pl
from jax.experimental.pallas import tpu as pltpu


_LANE = 128
_MAX_TILE = 8192  # perf: raised cap; VMEM budget (not this) is the gate.


def _conv1x1_relu_kernel(w_ref, x_ref, o_ref):
    # w_ref: (C_out, C_in)   x_ref: (C_in, ts)   o_ref: (C_out, ts)
    acc = jnp.dot(w_ref[...], x_ref[...], preferred_element_type=jnp.float32)
    o_ref[...] = jnp.maximum(acc, 0.0).astype(o_ref.dtype)


def _vmem_capacity_bytes():
    try:
        return int(pltpu.get_tpu_info().vmem_capacity_bytes)
    except Exception:
        return 64 * 1024 * 1024  # conservative fallback: assume v7x-sized VMEM


def _vmem_params():
    """(pipelined-buffer budget, vmem_limit_bytes) per TPU generation."""
    cap = _vmem_capacity_bytes()
    if cap >= 100 * 1024 * 1024:          # v5e / v6e: 128 MiB physical VMEM
        return 48 * 1024 * 1024, 64 * 1024 * 1024
    return 26 * 1024 * 1024, 40 * 1024 * 1024  # v7x-class: 64 MiB physical


def _spatial_cap(c_in, c_out, itemsize, budget):
    """Largest multiple-of-128 spatial tile fitting the VMEM budget."""
    weight_bytes = c_in * c_out * itemsize          # single-buffered (untiled VMEM)
    col_bytes = 2 * (c_in + c_out) * itemsize       # double-buffered act + out / column
    avail = max(budget - weight_bytes, 0)
    cap = (avail // max(col_bytes, 1)) // _LANE * _LANE
    return max(_LANE, min(_MAX_TILE, cap))


def conv1x1_relu_nchw(x_nchw, weight_oi, *, max_tile=None):
    """1x1 conv (bias=False) + ReLU, matching nn.Conv2d semantics.

    x_nchw:    (N, C_in, H, W) float32
    weight_oi: (C_out, C_in)   float32 (squeezed (C_out, C_in, 1, 1) weight)
    returns:   (N, C_out, H, W)

    Kept in f32 to match EGNet numerics; carrying x/out in bf16 (f32
    accumulate stays) would halve HBM traffic if the model tolerates it.
    """
    N, C_in, H, W = x_nchw.shape
    C_out = weight_oi.shape[0]
    HW = H * W

    # Free reshape (no transpose): channels on the sublane axis, spatial on lanes.
    x3 = x_nchw.reshape(N, C_in, HW)

    itemsize = jnp.dtype(x_nchw.dtype).itemsize
    budget, vmem_limit = _vmem_params()
    cap = _spatial_cap(C_in, C_out, itemsize, budget)
    if max_tile is not None:  # test hook / manual override
        cap = max(_LANE, min(cap, max_tile))

    if HW <= cap:
        ts, n_tiles = HW, 1  # single full-extent spatial block (always legal)
        # Give the second v7x TensorCore work when the whole grid would be 1 step.
        if N == 1 and ts % (2 * _LANE) == 0:
            ts, n_tiles = ts // 2, 2
    else:
        ts = cap                      # multiple of 128
        n_tiles = pl.cdiv(HW, ts)     # partial trailing block: OOB stores masked

    out3 = pl.pallas_call(
        _conv1x1_relu_kernel,
        out_shape=jax.ShapeDtypeStruct((N, C_out, HW), x_nchw.dtype),
        grid_spec=pltpu.PrefetchScalarGridSpec(
            num_scalar_prefetch=0,
            grid=(N, n_tiles),
            in_specs=[
                # Weight: untiled VMEM residency -> copied in once, single buffer.
                pl.BlockSpec(memory_space=pltpu.MemorySpace.VMEM),
                # Activation tile: full channel extent, ts spatial columns.
                pl.BlockSpec((pl.Squeezed(), C_in, ts), lambda n, s: (n, 0, s)),
            ],
            out_specs=pl.BlockSpec((pl.Squeezed(), C_out, ts), lambda n, s: (n, 0, s)),
        ),
        compiler_params=pltpu.CompilerParams(
            dimension_semantics=("parallel", "parallel"),
            vmem_limit_bytes=vmem_limit,
        ),
    )(weight_oi, x3)

    return out3.reshape(N, C_out, H, W)


class ConvertLayerPallas:
    """JAX/Pallas port of EGNet's ConvertLayer: per scale, 1x1 conv + ReLU."""

    def __init__(self, list_k, key):
        self.in_channels = list(list_k[0])
        self.out_channels = list(list_k[1])
        self.weights = []
        for cin, cout in zip(self.in_channels, self.out_channels):
            key, sub = jax.random.split(key)
            bound = 1.0 / jnp.sqrt(jnp.float32(cin))
            w = jax.random.uniform(
                sub, (cout, cin), dtype=jnp.float32, minval=-bound, maxval=bound
            )
            self.weights.append(w)

    def __call__(self, list_x):
        # TODO(synk): fuse scales into fewer pallas_calls (concatenate spatial
        # axes for matching (C_in, C_out), or drive all scales from one call
        # with PrefetchScalarGridSpec offsets) to amortize launch overhead on
        # the tiny deep-stage feature maps.
        return [conv1x1_relu_nchw(x, w) for x, w in zip(list_x, self.weights)]


def _reference(list_x, weights):
    """Plain-JAX reference for correctness check."""
    outs = []
    for x, w in zip(list_x, weights):
        y = jnp.einsum("nchw,oc->nohw", x, w)
        outs.append(jnp.maximum(y, 0.0))
    return outs


if __name__ == "__main__":
    key = jax.random.PRNGKey(0)

    # Small list_k consistent with ConvertLayer's structure:
    #   list_k[0] = backbone channel counts, list_k[1] = converted counts.
    list_k = [[4, 8, 16], [4, 4, 8]]
    spatial = [16, 8, 4]
    batch = 2

    key, *xkeys = jax.random.split(key, 1 + len(list_k[0]))
    list_x = [
        jax.random.normal(xk, (batch, cin, s, s), dtype=jnp.float32)
        for cin, s, xk in zip(list_k[0], spatial, xkeys)
    ]

    key, wkey = jax.random.split(key)
    layer = ConvertLayerPallas(list_k, wkey)

    outs = layer(list_x)
    outs = [jax.block_until_ready(o) for o in outs]

    refs = _reference(list_x, layer.weights)
    for o, r, cout, s in zip(outs, refs, list_k[1], spatial):
        assert o.shape == (batch, cout, s, s), (o.shape, (batch, cout, s, s))
        assert jnp.allclose(o, r, atol=1e-5, rtol=1e-5), "mismatch vs reference"

    # Exercise the partial-trailing-block path (HW=400 with ts forced to 128
    # -> cdiv gives 4 tiles, last one write-masked) against the reference.
    key, k1, k2 = jax.random.split(key, 3)
    w_small = layer.weights[1]  # (C_out=4, C_in=8)
    x_tail = jax.random.normal(k1, (1, 8, 20, 20), dtype=jnp.float32)
    y_tail = jax.block_until_ready(conv1x1_relu_nchw(x_tail, w_small, max_tile=128))
    r_tail = jnp.maximum(jnp.einsum("nchw,oc->nohw", x_tail, w_small), 0.0)
    assert jnp.allclose(y_tail, r_tail, atol=1e-5, rtol=1e-5), "partial-tile mismatch"

    # Exercise the N==1 two-tile split (so both v7x TensorCores get work).
    x_split = jax.random.normal(k2, (1, 8, 16, 16), dtype=jnp.float32)
    y_split = jax.block_until_ready(conv1x1_relu_nchw(x_split, w_small))
    r_split = jnp.maximum(jnp.einsum("nchw,oc->nohw", x_split, w_small), 0.0)
    assert jnp.allclose(y_split, r_split, atol=1e-5, rtol=1e-5), "split-tile mismatch"

    print("KERNEL_OK")
</pallas_src>

<mosaic_0001>
module attributes {stable_mosaic.version = 11 : i64} {
  func.func @_conv1x1_relu_kernel(%arg0: i32, %arg1: i32, %arg2: memref<4x4xf32, #tpu.memory_space<vmem>>, %arg3: memref<1x4x256xf32, #tpu.memory_space<vmem>>, %arg4: memref<1x4x256xf32, #tpu.memory_space<vmem>>) attributes {dimension_semantics = [#tpu.dimension_semantics<parallel>, #tpu.dimension_semantics<parallel>], iteration_bounds = array<i64: 2, 1>, scalar_prefetch = 0 : i64, scratch_operands = 0 : i64, tpu.core_type = #tpu.core_type<tc>, window_params = [{pipeline_mode = #tpu.pipeline_mode<synchronous>, transform_indices = @transform_0, window_bounds = array<i64: 4, 4>}, {transform_indices = @transform_1, window_bounds = array<i64: 1, 4, 256>}, {transform_indices = @transform_2, window_bounds = array<i64: 1, 4, 256>}]} {
    %c0 = arith.constant 0 : index
    %c0_0 = arith.constant 0 : index
    %0 = vector.load %arg2[%c0, %c0_0] : memref<4x4xf32, #tpu.memory_space<vmem>>, vector<4x4xf32>
    %c0_1 = arith.constant 0 : index
    %c0_2 = arith.constant 0 : index
    %c0_3 = arith.constant 0 : index
    %1 = vector.load %arg3[%c0_1, %c0_2, %c0_3] : memref<1x4x256xf32, #tpu.memory_space<vmem>>, vector<1x4x256xf32>
    %2 = vector.shape_cast %1 : vector<1x4x256xf32> to vector<4x256xf32>
    %cst = arith.constant dense<0.000000e+00> : vector<4x256xf32>
    %3 = tpu.matmul %0, %2, %cst {dimension_numbers = #tpu.dot_dimension_numbers<[1], [0], [0], [1], [0, 0, 1, 1], [], []>} : vector<4x4xf32>, vector<4x256xf32>, vector<4x256xf32> -> vector<4x256xf32>
    %cst_4 = arith.constant 0.000000e+00 : f32
    %4 = vector.broadcast %cst_4 : f32 to vector<4x256xf32>
    %5 = arith.maximumf %3, %4 : vector<4x256xf32>
    %c0_5 = arith.constant 0 : index
    %c0_6 = arith.constant 0 : index
    %c0_7 = arith.constant 0 : index
    %6 = vector.load %arg4[%c0_5, %c0_6, %c0_7] : memref<1x4x256xf32, #tpu.memory_space<vmem>>, vector<1x4x256xf32>
    %7 = vector.shape_cast %6 : vector<1x4x256xf32> to vector<4x256xf32>
    %8 = vector.shape_cast %5 : vector<4x256xf32> to vector<1x4x256xf32>
    tpu.vector_store %arg4[%c0_5, %c0_6, %c0_7], %8 {strides = array<i32>} : memref<1x4x256xf32, #tpu.memory_space<vmem>>, vector<1x4x256xf32>,
    return
  }
  func.func @transform_0(%arg0: i32, %arg1: i32) -> (i32, i32) {
    %c0_i32 = arith.constant 0 : i32
    %c0_i32_0 = arith.constant 0 : i32
    %c0_i32_1 = arith.constant 0 : i32
    return %c0_i32, %c0_i32_0 : i32, i32
  }
  func.func @transform_1(%arg0: i32, %arg1: i32) -> (i32, i32, i32) {
    %c0_i32 = arith.constant 0 : i32
    %c0_i32_0 = arith.constant 0 : i32
    return %arg0, %c0_i32, %arg1 : i32, i32, i32
  }
  func.func @transform_2(%arg0: i32, %arg1: i32) -> (i32, i32, i32) {
    %c0_i32 = arith.constant 0 : i32
    %c0_i32_0 = arith.constant 0 : i32
    return %arg0, %c0_i32, %arg1 : i32, i32, i32
  }
}

</mosaic_0001>

<bundles_post_ra>
// kernel: tpu_custom_call.1
= control target key start
LH: loop header
LB: loop body
LE: loop exit
PB: predicated region body
PF: predicated region fallthrough
CT: control target
= control target key end

     0   :  { %7 = vsyncpa [#allocation3], 0  ;;  %s814_s0 = inlined_call_operand.hbm [shape: f32[4,4], index: 0, kind: input, shape index: {}]   ;;  %s815_s1 = inlined_call_operand.hbm [shape: f32[2,4,256], index: 1, kind: input, shape index: {}]   ;;  %s816_s2 = inlined_call_operand.hbm [shape: f32[2,4,256], index: 2, kind: output, shape index: {}]  }
   0x1   :  { %8 = vsyncpa [#allocation6], 0 }
   0x2   :  { %10 = vsyncpa [#allocation6 + $0x1], 0 }
   0x3   :  { %11 = vsyncpa [#allocation4], 0 }
   0x4   :  { %13 = vsyncpa [#allocation4 + $0x1], 0  ;;  %s653_s9 = smov 0   ;;  %s655_s10 = smov 0  }
   0x5   :  { %s657_s11 = smov 0   ;;  %s659_s12 = smov 0  }
   0x6   :  { %s661_s13 = smov 0   ;;  %s663_s14 = smov 0  }
   0x7 LB: > { %s397_s15 = sadd.s32 4294967295, %s632_s14   ;;  %s398_s16 = sadd.s32 4294967294, %s632_s14   ;;  %s632_s14 = sphi %s663_s14, %s19_s14   ;;  %s628_s13 = sphi %s661_s13, %s833_s13   ;;  %s624_s12 = sphi %s659_s12, %s832_s12   ;;  %s620_s11 = sphi %s657_s11, %s831_s11   ;;  %s616_s10 = sphi %s655_s10, %s830_s10   ;;  %s612_s9 = sphi %s653_s9, %s829_s9  }
   0x8   : > { %p74_p0 = scmp.ne.s32.totalorder %s616_s10, %s612_s9  ;;  %p687_p1 = scmp.eq.s32.totalorder %s397_s15, 0 }
   0x9   : > { %p691_p2 = scmp.eq.s32.totalorder %s397_s15, 1  ;;  %p106_p3 = scmp.eq.s32.totalorder %s398_s16, 1 }
   0xa   : > { %p697_p4 = por %p687_p1, %p74_p0  ;;  %p399_p5 = scmp.ge.s32.totalorder %s632_s14, 1 }
   0xb   : > { %p702_p6 = por %p106_p3, %p74_p0  ;;  %p113_p7 = scmp.lt.s32.totalorder %s632_s14, 3 }
   0xc   : > { %s820_s19 = scalar_select %p697_p4, 1, 0 }
   0xd   : > { %s821_s20 = scalar_select %p702_p6, 1, 0 }
   0xe   : > { %p707_p8 = pnand %p399_p5, %p113_p7  ;;  %s634_s22 = smov [#allocation2]  }
   0xf   : > { %s126_s23 = sshll.u32 %s634_s22, 4  ;;  %s31_s25 = sadd.s32 1, %s628_s13  ;;  %s127_s23 = int_to_ptr.vmem [resolvable:$true] %s126_s23 }
  0x10   : > { %p427_p10 = pneg %p707_p8  ;;  %s61_s26 = sadd.s32 1, %s620_s11 }
  0x11   : > { %p33_p12 = scmp.ge.s32.totalorder %s31_s25, 2  ;;  %s505_s27 = scalar_lea.vmem %s127_s23, 64 }
  0x12   : > { %p716_p11 = pnand %p427_p10, %p687_p1  ;;  %p506_p0 = scmp.ne.s32.totalorder %s127_s23, %s505_s27 }
  0x13   : > { %p513_p7 = scmp.lt.s32.totalorder %s127_s23, %s127_s23  ;;  %p514_p6 = scmp.lt.s32.totalorder %s505_s27, %s505_s27 }
  0x14   : > { %p496_p13 = pneg %p716_p11 }
  0x15   : > { %p515_p9 = por %p514_p6, %p513_p7 }
  0x16   : > { %p508_p3 = pnand %p506_p0, %p496_p13 }
  0x18   : > { %p509_p5 = pneg %p508_p3 }
  0x1a   : > { %p516_p4 = pnand %p515_p9, %p509_p5 }
  0x1c   : > { %519 = shalt.err (!%p516_p4)
}
  0x1d   : > { %430 = dma.hbm_to_vmem [thread:$0]  (!%p716_p11), %s814_s0, 64, %s127_s23, [#allocation3]  }
  0x1e   : > { %s835_s25 = smov (%p33_p12, %s31_s25), 0  ;;  %p68_p6 = scmp.ne.s32.totalorder %s620_s11, %s616_s10 }
  0x1f   : > { %p69_p4 = scmp.eq.s32.totalorder %s632_s14, 0  ;;  %s56_s30 = ssub.s32 %s628_s13, %s835_s25 }
  0x20   : > { %p440_p9 = scmp.lt.s32.totalorder %s632_s14, 2  ;;  %p59_p10 = scmp.eq.s32.totalorder %s56_s30, 0 }
  0x21   : > { %p70_p13 = por %p69_p4, %p68_p6  ;;  %p739_p0 = por %p691_p2, %p68_p6 }
  0x22   : > { %s137_s4 = sand.u32 1, %s620_s11   ;;  %s417_s7 = sshll.u32 %s628_s13, 7 }
  0x23   : > { %s745_s5 = scalar_select %p59_p10, %s620_s11, %s61_s26  }
  0x24   : > { %s402_s6 = sshll.u32 %s137_s4, 3  ;;  %s149_s16 = scalar_lea.hbm %s815_s1, %s417_s7 }
  0x25   : > { %s141_s22 = scalar_lea.vmem [#allocation5], %s402_s6  ;;  %p751_p11 = pnand %p440_p9, %p70_p13 }
  0x26   : > { %s151_s23 = sshll.u32 %s141_s22, 4  ;;  %s138_s18 = scalar_lea.sflag [#allocation6], %s137_s4  ;;  %s152_s23 = int_to_ptr.vmem [resolvable:$true] %s151_s23 }
  0x27   : > { %p522_p2 = pneg %p751_p11  ;;  %s533_s27 = scalar_lea.vmem %s152_s23, 128 }
  0x28   : > { %p534_p12 = scmp.ne.s32.totalorder %s152_s23, %s533_s27  ;;  %s635_s26 = smov [#allocation5]  }
  0x29   : > { %s538_s28 = sshll.u32 %s635_s26, 4  ;;  %s539_s28 = int_to_ptr.vmem [resolvable:$false] %s538_s28 }
  0x2a   : > { %p536_p3 = pnand %p534_p12, %p522_p2  ;;  %s540_s29 = scalar_lea.vmem %s539_s28, 256 }
  0x2b   : > { %p541_p7 = scmp.lt.s32.totalorder %s152_s23, %s539_s28  ;;  %p542_p6 = scmp.lt.s32.totalorder %s540_s29, %s533_s27 }
  0x2c   : > { %p537_p5 = pneg %p536_p3 }
  0x2d   : > { %p543_p4 = por %p542_p6, %p541_p7 }
  0x2f   : > { %p544_p10 = pnand %p543_p4, %p537_p5 }
  0x31   : > { %547 = shalt.err (!%p544_p10)
}
  0x32   : > { %434 = dma.hbm_to_vmem [thread:$0]  (!%p751_p11), %s149_s16, 128, %s152_s23, %s138_s18  }
  0x33   : > { %160 = sbr.rel (%p707_p8) target bundleno = 278 (0x116), region = 28 }
  0x38   : > { %599 = dma.done.wait (%p687_p1), [#allocation3], 64  }
  0x39   : > { %601 = vsyncadd (%p687_p1), [#allocation3], 4294967232  ;;  %s766_s30 = sand.u32 1, %s616_s10   ;;  %p826_p9 = scmp.ne.s32.totalorder %s820_s19, 0 }
  0x3a   : > { %s407_s4 = sshll.u32 %s766_s30, 3  ;;  %s167_s6 = scalar_lea.sflag [#allocation6], %s766_s30 }
  0x3b   : > { %s170_s7 = scalar_lea.vmem [#allocation5], %s407_s4 }
  0x3c   : > { %603 = dma.done.wait (%p826_p9), %s167_s6, 128  }
  0x3d   : > { %605 = vsyncadd (%p826_p9), %s167_s6, 4294967168  ;;  %v636_v0 = vmov 0.0   ;;  %v194_v1 = vld [vmem:[%s170_s7] sm:$0xff]  ;;  %vm201_vm0 = vcmask 1043456   ;;  %v193_v3 = vld [vmem:[#allocation2] sm:$0xf] }
  0x3e   : > { %270 = vmatprep.mubr.f32.mxu0 %v636_v0  ;;  %v196_v2 = vcombine.high %v194_v1, %v194_v1  ;;  %vm197_vm1 = vcmask 31744   ;;  %s418_s17 = sshll.u32 %s624_s12, 7  ;;  %s190_s21 = scalar_lea.vmem [#allocation7], %s407_s4 }
  0x3f   : > { %s301_s8 = sshll.u32 %s190_s21, 4  ;;  %s299_s16 = scalar_lea.hbm %s816_s2, %s418_s17  ;;  %s302_s8 = int_to_ptr.vmem [resolvable:$true] %s301_s8 }
  0x40   : > { %409 = vmatprep.subr.msk.mxu0 %vm201_vm0, %v196_v2  ;;  %s285_s22 = scalar_lea.sflag [#allocation4], %s766_s30  ;;  %s548_s23 = scalar_lea.vmem %s302_s8, 128 }
  0x41   : > { %410 = vmatpush1.msk.msra.mxu0 %vm201_vm0, %v194_v1  ;;  %p549_p1 = scmp.ne.s32.totalorder %s302_s8, %s548_s23  ;;  %s637_s24 = smov [#allocation7]  }
  0x42   : > { %411 = vmatmul.mubr.msk.f32.vlgmr.msra.gmra.mxu0 %vm197_vm1, %v193_v3  ;;  %s552_s18 = sshll.u32 %s637_s24, 4  ;;  %s553_s18 = int_to_ptr.vmem [resolvable:$false] %s552_s18 }
  0x43   : > { %p550_p8 = pnand %p549_p1, %p739_p0  ;;  %s554_s12 = scalar_lea.vmem %s553_s18, 256 }
  0x44   : > { %p555_p11 = scmp.lt.s32.totalorder %s302_s8, %s553_s18  ;;  %p556_p2 = scmp.lt.s32.totalorder %s554_s12, %s548_s23 }
  0x45   : > { %p551_p13 = pneg %p550_p8 }
  0x46   : > { %p557_p12 = por %p556_p2, %p555_p11 }
  0x48   : > { %p558_p3 = pnand %p557_p12, %p551_p13 }
 0x102   : > { %v272_v4 = vpop.f32.mrf.mxu0 }
 0x103   : > { %v277_v6 = vmax.f32 %v272_v4, 0.0 }
 0x104   : > { %v274_v5 = vpop.f32.mrf.mxu0 }
 0x105   : > { %v278_v7 = vmax.f32 %v274_v5, 0.0 }
 0x107   : > { %v281_v8 = vcombine.low %v277_v6, %v278_v7 }
 0x109   : > { %283 = vst [vmem:[%s190_s21] sm:$0xff] %v281_v8 }
 0x10a   : > { %561 = shalt.err (!%p558_p3)
}
 0x10b   : > { %s562_s27 = scalar_lea.hbm %s299_s16, 128  ;;  %s566_s29 = scalar_lea.hbm %s816_s2, 256 }
 0x10c   : > { %p563_p5 = scmp.ne.s32.totalorder %s299_s16, %s562_s27  ;;  %p567_p4 = scmp.lt.s32.totalorder %s299_s16, %s816_s2 }
 0x10d   : > { %p568_p10 = scmp.lt.s32.totalorder %s566_s29, %s562_s27 }
 0x10e   : > { %p564_p7 = pnand %p563_p5, %p739_p0 }
 0x10f   : > { %p569_p9 = por %p568_p10, %p567_p4 }
 0x110   : > { %p565_p6 = pneg %p564_p7 }
 0x112   : > { %p570_p1 = pnand %p569_p9, %p565_p6 }
 0x114   : > { %573 = shalt.err (!%p570_p1)
}
 0x115   : > { %425 = dma.vmem_to_hbm [thread:$0]  (%p739_p0), %s302_s8, 128, %s299_s16, %s285_s22  }
 0x116 PF: > { %s313_s6 = sand.u32 1, %s612_s9   ;;  %p827_p8 = scmp.ne.s32.totalorder %s821_s20, 0 }
 0x117   : > { %p828_p13 = scmp.ge.s32.totalorder %s632_s14, 2  ;;  %s314_s7 = scalar_lea.sflag [#allocation4], %s313_s6 }
 0x119   : > { %p436_p11 = pnand %p828_p13, %p827_p8 }
 0x11b   : > { %p437_p2 = pneg %p436_p11 }
 0x11d   : > { %607 = dma.done.wait (%p437_p2), %s314_s7, 128  }
 0x11e   : > { %609 = vsyncadd (%p437_p2), %s314_s7, 4294967168  ;;  %s19_s14 = sadd.s32 1, %s632_s14   ;;  %s829_s9 = smov %s616_s10 }
 0x11f   : > { %p16_p12 = scmp.ge.s32.totalorder %s19_s14, 4   ;;  %s830_s10 = smov %s620_s11 }
 0x120   : > { %s831_s11 = smov %s745_s5  ;;  %s832_s12 = smov %s628_s13 }
 0x121   : > { %s833_s13 = smov %s835_s25  ;;  %18 = sbr.rel (!%p16_p12) target bundleno = 7 (0x7), region = 78 }
 0x126   :  { %319 = vsyncpa [#allocation3], 1 }
 0x127   :  { %321 = vsyncpa [#allocation3 + $0x1], 1 }
 0x128   :  { %322 = vsyncpa [#allocation6], 1 }
 0x129   :  { %324 = vsyncpa [#allocation6 + $0x1], 1 }
 0x12a   :  { %325 = vsyncpa [#allocation4], 1 }
 0x12b   :  { %327 = vsyncpa [#allocation4 + $0x1], 1 }

</bundles_post_ra>
